<compile_context>
chip_gen: v7x
topology: tpu7x:2x2x1
jax: 0.10.0
libtpu: 0.0.40
codegen_flags: <defaults>
</compile_context>

<pallas_src>
import numpy as np
import jax
import jax.numpy as jnp
from jax import lax
from jax.experimental import pallas as pl
from jax.experimental.pallas import tpu as pltpu


# ---------------------------------------------------------------------------
# Fused kernel: 1x1 conv -> ConvTranspose2d(k=4, s=2, p=1) -> 1x1 conv (+skip),
# each followed by folded-BN + ReLU.  One grid step = one (image, row-stripe).
# ---------------------------------------------------------------------------

def _make_decoder_kernel(has_skip, has_halo, W, TH, compute_dtype):
    M = TH * W  # spatial rows handled per stripe (flattened (i, j))

    def kernel(*refs):
        it = iter(refs)
        x_ref = next(it)
        if has_halo:
            xt_ref = next(it)          # x row  h*TH - 1   (clamped)
            xb_ref = next(it)          # x row (h+1)*TH    (clamped)
        w1_ref, b1_ref = next(it), next(it)
        w2_ref, b2_ref = next(it), next(it)
        w3_ref, b3_ref = next(it), next(it)
        s_ref = next(it) if has_skip else None
        o_ref = next(it)

        cmid = w1_ref.shape[1]
        cdt = compute_dtype
        h = pl.program_id(1)

        # ---- stage 1: 1x1 conv (BN folded) + bias + ReLU --------------------
        def conv1(xv):                                      # (rows, Cin) -> f32
            y = jnp.dot(xv.astype(cdt), w1_ref[...],
                        preferred_element_type=jnp.float32)
            return jnp.maximum(y + b1_ref[...], 0.0)

        y1 = conv1(x_ref[0])                                 # (M, Cmid) f32

        # y1 halo rows (zero outside the image; recomputed pointwise otherwise)
        if has_halo:
            top = conv1(xt_ref[0])                           # (W, Cmid)
            bot = conv1(xb_ref[0])
            top = jnp.where(h == 0, jnp.zeros_like(top), top)
            bot = jnp.where(h == pl.num_programs(1) - 1,
                            jnp.zeros_like(bot), bot)
        else:
            top = jnp.zeros((W, cmid), jnp.float32)
            bot = jnp.zeros((W, cmid), jnp.float32)

        # row-shifted sources: value at stripe row i taken from row i-1 / i+1
        r_up = jnp.concatenate([top, y1[:M - W]], axis=0)    # (M, Cmid)
        r_dn = jnp.concatenate([y1[W:], bot], axis=0)        # (M, Cmid)

        # column-shift masks (j == 0 / j == W-1) on the flattened (i, j) rows
        col = lax.broadcasted_iota(jnp.int32, (M, 1), 0) % W
        at_first = col == 0
        at_last = col == W - 1

        def col_variants(a):
            # (value from j-1, from j, from j+1); sublane rolls run on the XLU.
            left = jnp.where(at_first, jnp.zeros_like(a),
                             pltpu.roll(a, shift=1, axis=0))
            right = jnp.where(at_last, jnp.zeros_like(a),
                              pltpu.roll(a, shift=M - 1, axis=0))
            return (left.astype(cdt), a.astype(cdt), right.astype(cdt))

        up_v, mid_v, dn_v = col_variants(r_up), col_variants(y1), col_variants(r_dn)
        # per output-row parity: the two row sources that feed it
        sources = ((up_v, mid_v), (mid_v, dn_v))

        # ---- stages 2 + 3, one pass per output-row parity --------------------
        # w2_ref[py*6 + rl*3 + cv] is a (Cmid, 2*Cmid) tap block whose lane
        # halves are the two output-column parities (zeroed where the tap does
        # not contribute).  w3_ref = block_diag(w3, w3) keeps the px packing
        # through the final 1x1 conv -> y3 lanes ordered (px, cout).
        for py in range(2):
            acc = jnp.zeros((M, 2 * cmid), jnp.float32)
            for rl in range(2):
                for cv in range(3):
                    acc = acc + jnp.dot(sources[py][rl][cv],
                                        w2_ref[py * 6 + rl * 3 + cv],
                                        preferred_element_type=jnp.float32)
            y2 = jnp.maximum(acc + b2_ref[...], 0.0)          # (M, 2*Cmid)
            y3 = jnp.dot(y2.astype(cdt), w3_ref[...],
                         preferred_element_type=jnp.float32)
            y3 = jnp.maximum(y3 + b3_ref[...], 0.0)           # (M, 2*Cout)
            y3 = y3.reshape(TH, W, y3.shape[-1])
            if has_skip:
                y3 = y3 + s_ref[0, :, py, :, :]               # skip AFTER ReLU
            o_ref[0, :, py, :, :] = y3.astype(o_ref.dtype)

    return kernel


# ---------------------------------------------------------------------------
# Host-side parameter folding / packing (runs once; tiny tensors)
# ---------------------------------------------------------------------------

def fold_bn(gamma, beta, mean, var, conv_bias=None, eps=1e-5):
    scale = gamma / jnp.sqrt(var + eps)
    b = beta - scale * mean
    if conv_bias is not None:
        b = b + scale * conv_bias
    return scale, b


# ConvTranspose2d(k=4, s=2, p=1):  out(2i+py, 2j+px) sums taps
#   rows: py=0 -> (i-1, ky=3), (i, ky=1);  py=1 -> (i, ky=2), (i+1, ky=0)
#   cols: px=0 -> (j-1, kx=3), (j, kx=1);  px=1 -> (j, kx=2), (j+1, kx=0)
_KY = ((3, 1), (2, 0))                   # [py][row-slot]
_KX = ((3, None), (1, 2), (None, 0))     # [col-variant] -> (kx for px=0, px=1)


def pack_decoder_params(w1, wt, w3, sb1, sb2, sb3):
    """Fold BN affines into the conv weights and pack the transpose-conv taps
    into 12 (Cmid, 2*Cmid) blocks indexed by (row parity, row slot, col shift);
    both output-column parities share each MXU dot."""
    s1, b1 = sb1
    s2, b2 = sb2
    s3, b3 = sb3
    cin, cmid = np.asarray(w1).shape
    cout = np.asarray(w3).shape[1]

    w1s = np.asarray(w1, np.float32) * np.asarray(s1, np.float32)[None, :]
    wts = np.asarray(wt, np.float32) * np.asarray(s2, np.float32)[None, None, None, :]
    w3s = np.asarray(w3, np.float32) * np.asarray(s3, np.float32)[None, :]

    w2p = np.zeros((2, 2, 3, cmid, 2 * cmid), np.float32)
    for py in range(2):
        for rl in range(2):
            ky = _KY[py][rl]
            for cv in range(3):
                kx0, kx1 = _KX[cv]
                if kx0 is not None:
                    w2p[py, rl, cv, :, :cmid] = wts[ky, kx0]
                if kx1 is not None:
                    w2p[py, rl, cv, :, cmid:] = wts[ky, kx1]
    w2p = w2p.reshape(12, cmid, 2 * cmid)

    w3d = np.zeros((2 * cmid, 2 * cout), np.float32)
    w3d[:cmid, :cout] = w3s
    w3d[cmid:, cout:] = w3s

    return {
        "w1": jnp.asarray(w1s),
        "b1": jnp.asarray(b1, jnp.float32).reshape(1, cmid),
        "w2": jnp.asarray(w2p),
        "b2": jnp.tile(jnp.asarray(b2, jnp.float32), 2).reshape(1, 2 * cmid),
        "w3": jnp.asarray(w3d),
        "b3": jnp.tile(jnp.asarray(b3, jnp.float32), 2).reshape(1, 2 * cout),
    }


# ---------------------------------------------------------------------------
# Wrappers
# ---------------------------------------------------------------------------

def decoder_block_forward_nhwc(x, packed, skip=None, *, tile_h=None,
                               compute_dtype=jnp.bfloat16):
    """NHWC core entry point.  Returns (N, 2H, 2W, Cout) float32."""
    N, H, W, Cin = x.shape
    Cmid = packed["w1"].shape[1]
    Cout2 = packed["w3"].shape[1]
    Cout = Cout2 // 2

    # ---- row-stripe selection (bounds the per-step VMEM working set) --------
    if tile_h is None:
        tile_h = H
        for cand in range(min(H, max(1, 2048 // max(W, 1))), 0, -1):
            if H % cand == 0:
                tile_h = cand
                break
    if H % tile_h != 0:
        tile_h = H
    if tile_h < H and (W % 8 != 0 or (tile_h * W) % 8 != 0):
        tile_h = H  # TODO(synk): pad W to a multiple of 8 to allow striping.
    n_stripes = H // tile_h
    has_halo = n_stripes > 1
    has_skip = skip is not None

    cdt = compute_dtype
    w1 = packed["w1"].astype(cdt)
    w2 = packed["w2"].astype(cdt)
    w3 = packed["w3"].astype(cdt)
    b1, b2, b3 = packed["b1"], packed["b2"], packed["b3"]

    x3 = x.reshape(N, H * W, Cin)                              # free reshape
    args = [x3]
    in_specs = [pl.BlockSpec((1, tile_h * W, Cin), lambda n, h: (n, h, 0))]
    if has_halo:
        # same array, two extra 1-row windows (clamped; masked in-kernel at the
        # image boundary) -> auto-pipelined halo without overlapping blocks.
        args += [x3, x3]
        in_specs += [
            pl.BlockSpec((1, W, Cin),
                         lambda n, h: (n, jnp.maximum(h * tile_h - 1, 0), 0)),
            pl.BlockSpec((1, W, Cin),
                         lambda n, h: (n, jnp.minimum((h + 1) * tile_h, H - 1), 0)),
        ]

    args += [w1, b1, w2, b2, w3, b3]
    in_specs += [
        pl.BlockSpec(w1.shape, lambda n, h: (0, 0)),
        pl.BlockSpec(b1.shape, lambda n, h: (0, 0)),
        pl.BlockSpec(w2.shape, lambda n, h: (0, 0, 0)),
        pl.BlockSpec(b2.shape, lambda n, h: (0, 0)),
        pl.BlockSpec(w3.shape, lambda n, h: (0, 0)),
        pl.BlockSpec(b3.shape, lambda n, h: (0, 0)),
    ]

    if has_skip:
        # (N, 2H, 2W, Cout) -> (N, H, 2, W, 2*Cout) is a free reshape matching
        # the kernel's interleave-friendly output layout.
        args.append(skip.reshape(N, H, 2, W, Cout2))
        in_specs.append(pl.BlockSpec((1, tile_h, 2, W, Cout2),
                                     lambda n, h: (n, h, 0, 0, 0)))

    flops = int(2 * N * H * W * Cin * Cmid
                + 48 * N * H * W * Cmid * Cmid
                + 16 * N * H * W * Cmid * Cout)
    bytes_accessed = int(x.size * x.dtype.itemsize
                         + (skip.size * skip.dtype.itemsize if has_skip else 0)
                         + N * 4 * H * W * Cout * 4
                         + sum(int(np.prod(a.shape)) * a.dtype.itemsize
                               for a in (w1, b1, w2, b2, w3, b3)))

    out = pl.pallas_call(
        _make_decoder_kernel(has_skip, has_halo, W, tile_h, cdt),
        out_shape=jax.ShapeDtypeStruct((N, H, 2, W, Cout2), jnp.float32),
        grid=(N, n_stripes),
        in_specs=in_specs,
        out_specs=pl.BlockSpec((1, tile_h, 2, W, Cout2),
                               lambda n, h: (n, h, 0, 0, 0)),
        compiler_params=pltpu.CompilerParams(
            dimension_semantics=("parallel", "parallel"),
            # stays within v7x's 64 MiB physical VMEM; v5e/v6e have headroom
            vmem_limit_bytes=48 * 1024 * 1024),
        cost_estimate=pl.CostEstimate(flops=flops, transcendentals=0,
                                      bytes_accessed=bytes_accessed),
    )(*args)

    # free (contiguous) reshape: [n, i, py, j, px*Cout+c] -> [n, 2i+py, 2j+px, c]
    return out.reshape(N, 2 * H, 2 * W, Cout)


def decoder_block_forward(x_nchw, packed, skip_nchw=None, **kw):
    """PyTorch-layout boundary wrapper (NCHW in/out).  For peak performance
    keep the whole network NHWC and call decoder_block_forward_nhwc directly:
    these transposes are extra HBM passes."""
    x = jnp.transpose(x_nchw, (0, 2, 3, 1))
    skip = None if skip_nchw is None else jnp.transpose(skip_nchw, (0, 2, 3, 1))
    y = decoder_block_forward_nhwc(x, packed, skip, **kw)
    return jnp.transpose(y, (0, 3, 1, 2))


# ---------------------------------------------------------------------------
# Pure-numpy reference (mirrors PyTorch semantics directly), NHWC
# ---------------------------------------------------------------------------

def _ref_forward_nhwc(x, p, skip=None):
    x = np.asarray(x, np.float64)
    s1, b1 = [np.asarray(a, np.float64) for a in p["sb1"]]
    y1 = np.maximum(np.einsum("nhwc,cd->nhwd", x, np.asarray(p["w1"], np.float64)) * s1 + b1, 0.0)
    N, H, W, Cm = y1.shape
    wt = np.asarray(p["wt"], np.float64)                      # (4,4,Cin,Cout)
    full = np.zeros((N, 2 * H + 2, 2 * W + 2, Cm), np.float64)
    for ky in range(4):                                        # o = 2*i - 1 + k
        for kx in range(4):
            contrib = np.einsum("nhwc,cd->nhwd", y1, wt[ky, kx])
            full[:, ky:ky + 2 * H:2, kx:kx + 2 * W:2, :] += contrib
    s2, b2 = [np.asarray(a, np.float64) for a in p["sb2"]]
    y2 = np.maximum(full[:, 1:2 * H + 1, 1:2 * W + 1, :] * s2 + b2, 0.0)
    s3, b3 = [np.asarray(a, np.float64) for a in p["sb3"]]
    y3 = np.maximum(np.einsum("nhwc,cd->nhwd", y2, np.asarray(p["w3"], np.float64)) * s3 + b3, 0.0)
    if skip is not None:
        y3 = y3 + np.asarray(skip, np.float64)
    return y3


# ---------------------------------------------------------------------------
# Main
# ---------------------------------------------------------------------------

if __name__ == "__main__":
    in_channels, out_channels = 32, 16
    cmid = in_channels // 4
    N, H, W = 2, 8, 8

    key = jax.random.PRNGKey(0)
    keys = jax.random.split(key, 10)

    def bn_params(k, c):
        k1, k2, k3, k4 = jax.random.split(k, 4)
        gamma = 1.0 + 0.1 * jax.random.normal(k1, (c,), jnp.float32)
        beta = 0.1 * jax.random.normal(k2, (c,), jnp.float32)
        mean = 0.1 * jax.random.normal(k3, (c,), jnp.float32)
        var = jax.random.uniform(k4, (c,), jnp.float32, minval=0.5, maxval=1.5)
        return gamma, beta, mean, var

    # weights in kernel-friendly layout: 1x1 convs as (Cin, Cout),
    # ConvTranspose2d as (ky, kx, Cin, Cout)
    w1 = 0.1 * jax.random.normal(keys[0], (in_channels, cmid), jnp.float32)
    wt = 0.1 * jax.random.normal(keys[1], (4, 4, cmid, cmid), jnp.float32)
    bt = 0.1 * jax.random.normal(keys[2], (cmid,), jnp.float32)
    w3 = 0.1 * jax.random.normal(keys[3], (cmid, out_channels), jnp.float32)

    sb1 = fold_bn(*bn_params(keys[4], cmid))
    sb2 = fold_bn(*bn_params(keys[5], cmid), conv_bias=bt)
    sb3 = fold_bn(*bn_params(keys[6], out_channels))

    packed = pack_decoder_params(w1, wt, w3, sb1, sb2, sb3)

    x = jax.random.normal(keys[7], (N, H, W, in_channels), jnp.float32)
    skip = jax.random.normal(keys[8], (N, 2 * H, 2 * W, out_channels), jnp.float32)

    ref_params = {"w1": w1, "wt": wt, "w3": w3, "sb1": sb1, "sb2": sb2, "sb3": sb3}
    ref_skip = _ref_forward_nhwc(np.asarray(x), ref_params, np.asarray(skip))
    ref_noskip = _ref_forward_nhwc(np.asarray(x), ref_params, None)

    # 1) f32 path, 2 row stripes (exercises the stripe halo), with skip.
    out_a = decoder_block_forward_nhwc(x, packed, skip, tile_h=4,
                                       compute_dtype=jnp.float32)
    out_a = jax.block_until_ready(out_a)
    np.testing.assert_allclose(np.asarray(out_a), ref_skip, rtol=1e-3, atol=1e-3)

    # 2) bf16 MXU path, 4 row stripes, no skip (looser tolerance for bf16).
    out_b = decoder_block_forward_nhwc(x, packed, None, tile_h=2,
                                       compute_dtype=jnp.bfloat16)
    out_b = jax.block_until_ready(out_b)
    np.testing.assert_allclose(np.asarray(out_b), ref_noskip, rtol=5e-2, atol=5e-2)

    # 3) auto stripe size (single stripe at this tiny plane), bf16, with skip.
    out_c = decoder_block_forward_nhwc(x, packed, skip)
    out_c = jax.block_until_ready(out_c)
    np.testing.assert_allclose(np.asarray(out_c), ref_skip, rtol=5e-2, atol=5e-2)

    print("KERNEL_OK")
</pallas_src>

<mosaic_0001>
module attributes {stable_mosaic.version = 11 : i64} {
  func.func @kernel(%arg0: i32, %arg1: i32, %arg2: memref<1x32x32xf32, #tpu.memory_space<vmem>>, %arg3: memref<1x8x32xf32, #tpu.memory_space<vmem>>, %arg4: memref<1x8x32xf32, #tpu.memory_space<vmem>>, %arg5: memref<32x8xf32, #tpu.memory_space<vmem>>, %arg6: memref<1x8xf32, #tpu.memory_space<vmem>>, %arg7: memref<12x8x16xf32, #tpu.memory_space<vmem>>, %arg8: memref<1x16xf32, #tpu.memory_space<vmem>>, %arg9: memref<16x32xf32, #tpu.memory_space<vmem>>, %arg10: memref<1x32xf32, #tpu.memory_space<vmem>>, %arg11: memref<1x4x2x8x32xf32, #tpu.memory_space<vmem>>, %arg12: memref<1x4x2x8x32xf32, #tpu.memory_space<vmem>>) attributes {dimension_semantics = [#tpu.dimension_semantics<parallel>, #tpu.dimension_semantics<parallel>], iteration_bounds = array<i64: 2, 2>, scalar_prefetch = 0 : i64, scratch_operands = 0 : i64, tpu.core_type = #tpu.core_type<tc>, window_params = [{transform_indices = @transform_0, window_bounds = array<i64: 1, 32, 32>}, {transform_indices = @transform_1, window_bounds = array<i64: 1, 8, 32>}, {transform_indices = @transform_2, window_bounds = array<i64: 1, 8, 32>}, {pipeline_mode = #tpu.pipeline_mode<synchronous>, transform_indices = @transform_3, window_bounds = array<i64: 32, 8>}, {pipeline_mode = #tpu.pipeline_mode<synchronous>, transform_indices = @transform_4, window_bounds = array<i64: 1, 8>}, {pipeline_mode = #tpu.pipeline_mode<synchronous>, transform_indices = @transform_5, window_bounds = array<i64: 12, 8, 16>}, {pipeline_mode = #tpu.pipeline_mode<synchronous>, transform_indices = @transform_6, window_bounds = array<i64: 1, 16>}, {pipeline_mode = #tpu.pipeline_mode<synchronous>, transform_indices = @transform_7, window_bounds = array<i64: 16, 32>}, {pipeline_mode = #tpu.pipeline_mode<synchronous>, transform_indices = @transform_8, window_bounds = array<i64: 1, 32>}, {transform_indices = @transform_9, window_bounds = array<i64: 1, 4, 2, 8, 32>}, {transform_indices = @transform_10, window_bounds = array<i64: 1, 4, 2, 8, 32>}]} {
    %c0 = arith.constant 0 : index
    %c0_0 = arith.constant 0 : index
    %c0_1 = arith.constant 0 : index
    %0 = vector.load %arg2[%c0, %c0_0, %c0_1] : memref<1x32x32xf32, #tpu.memory_space<vmem>>, vector<1x32x32xf32>
    %1 = vector.shape_cast %0 : vector<1x32x32xf32> to vector<32x32xf32>
    %c0_2 = arith.constant 0 : index
    %c0_3 = arith.constant 0 : index
    %2 = vector.load %arg5[%c0_2, %c0_3] : memref<32x8xf32, #tpu.memory_space<vmem>>, vector<32x8xf32>
    %cst = arith.constant dense<0.000000e+00> : vector<32x8xf32>
    %3 = tpu.matmul %1, %2, %cst {dimension_numbers = #tpu.dot_dimension_numbers<[1], [0], [0], [1], [0, 0, 1, 1], [], []>} : vector<32x32xf32>, vector<32x8xf32>, vector<32x8xf32> -> vector<32x8xf32>
    %c0_4 = arith.constant 0 : index
    %c0_5 = arith.constant 0 : index
    %4 = vector.load %arg6[%c0_4, %c0_5] : memref<1x8xf32, #tpu.memory_space<vmem>>, vector<1x8xf32>
    %5 = vector.broadcast %4 : vector<1x8xf32> to vector<32x8xf32>
    %6 = arith.addf %3, %5 : vector<32x8xf32>
    %cst_6 = arith.constant 0.000000e+00 : f32
    %7 = vector.broadcast %cst_6 : f32 to vector<32x8xf32>
    %8 = arith.maximumf %6, %7 : vector<32x8xf32>
    %c0_7 = arith.constant 0 : index
    %c0_8 = arith.constant 0 : index
    %c0_9 = arith.constant 0 : index
    %9 = vector.load %arg3[%c0_7, %c0_8, %c0_9] : memref<1x8x32xf32, #tpu.memory_space<vmem>>, vector<1x8x32xf32>
    %10 = vector.shape_cast %9 : vector<1x8x32xf32> to vector<8x32xf32>
    %c0_10 = arith.constant 0 : index
    %c0_11 = arith.constant 0 : index
    %11 = vector.load %arg5[%c0_10, %c0_11] : memref<32x8xf32, #tpu.memory_space<vmem>>, vector<32x8xf32>
    %cst_12 = arith.constant dense<0.000000e+00> : vector<8x8xf32>
    %12 = tpu.matmul %10, %11, %cst_12 {dimension_numbers = #tpu.dot_dimension_numbers<[1], [0], [0], [1], [0, 0, 1, 1], [], []>} : vector<8x32xf32>, vector<32x8xf32>, vector<8x8xf32> -> vector<8x8xf32>
    %c0_13 = arith.constant 0 : index
    %c0_14 = arith.constant 0 : index
    %13 = vector.load %arg6[%c0_13, %c0_14] : memref<1x8xf32, #tpu.memory_space<vmem>>, vector<1x8xf32>
    %14 = vector.broadcast %13 : vector<1x8xf32> to vector<8x8xf32>
    %15 = arith.addf %12, %14 : vector<8x8xf32>
    %cst_15 = arith.constant 0.000000e+00 : f32
    %16 = vector.broadcast %cst_15 : f32 to vector<8x8xf32>
    %17 = arith.maximumf %15, %16 : vector<8x8xf32>
    %c0_16 = arith.constant 0 : index
    %c0_17 = arith.constant 0 : index
    %c0_18 = arith.constant 0 : index
    %18 = vector.load %arg4[%c0_16, %c0_17, %c0_18] : memref<1x8x32xf32, #tpu.memory_space<vmem>>, vector<1x8x32xf32>
    %19 = vector.shape_cast %18 : vector<1x8x32xf32> to vector<8x32xf32>
    %c0_19 = arith.constant 0 : index
    %c0_20 = arith.constant 0 : index
    %20 = vector.load %arg5[%c0_19, %c0_20] : memref<32x8xf32, #tpu.memory_space<vmem>>, vector<32x8xf32>
    %cst_21 = arith.constant dense<0.000000e+00> : vector<8x8xf32>
    %21 = tpu.matmul %19, %20, %cst_21 {dimension_numbers = #tpu.dot_dimension_numbers<[1], [0], [0], [1], [0, 0, 1, 1], [], []>} : vector<8x32xf32>, vector<32x8xf32>, vector<8x8xf32> -> vector<8x8xf32>
    %c0_22 = arith.constant 0 : index
    %c0_23 = arith.constant 0 : index
    %22 = vector.load %arg6[%c0_22, %c0_23] : memref<1x8xf32, #tpu.memory_space<vmem>>, vector<1x8xf32>
    %23 = vector.broadcast %22 : vector<1x8xf32> to vector<8x8xf32>
    %24 = arith.addf %21, %23 : vector<8x8xf32>
    %cst_24 = arith.constant 0.000000e+00 : f32
    %25 = vector.broadcast %cst_24 : f32 to vector<8x8xf32>
    %26 = arith.maximumf %24, %25 : vector<8x8xf32>
    %c0_i32 = arith.constant 0 : i32
    %27 = arith.cmpi eq, %arg1, %c0_i32 : i32
    %cst_25 = arith.constant 0.000000e+00 : f32
    %28 = vector.broadcast %cst_25 : f32 to vector<8x8xf32>
    %29 = arith.select %27, %28, %17 : vector<8x8xf32>
    %c1_i32 = arith.constant 1 : i32
    %30 = arith.cmpi eq, %arg1, %c1_i32 : i32
    %cst_26 = arith.constant 0.000000e+00 : f32
    %31 = vector.broadcast %cst_26 : f32 to vector<8x8xf32>
    %32 = arith.select %30, %31, %26 : vector<8x8xf32>
    %33 = vector.extract_strided_slice %8 {offsets = [0, 0], sizes = [24, 8], strides = [1, 1]} : vector<32x8xf32> to vector<24x8xf32>
    %34 = tpu.concatenate %29, %33 in 0 : vector<8x8xf32>, vector<24x8xf32> -> vector<32x8xf32>
    %35 = vector.extract_strided_slice %8 {offsets = [8, 0], sizes = [24, 8], strides = [1, 1]} : vector<32x8xf32> to vector<24x8xf32>
    %36 = tpu.concatenate %35, %32 in 0 : vector<24x8xf32>, vector<8x8xf32> -> vector<32x8xf32>
    %37 = tpu.iota {dimensions = array<i32: 0>} : vector<32x1xi32>
    %c8_i32 = arith.constant 8 : i32
    %c0_i32_27 = arith.constant 0 : i32
    %38 = arith.cmpi eq, %c8_i32, %c0_i32_27 : i32
    %c1_i32_28 = arith.constant 1 : i32
    %39 = arith.select %38, %c1_i32_28, %c8_i32 : i32
    %40 = vector.broadcast %39 : i32 to vector<32x1xi32>
    %41 = arith.remsi %37, %40 : vector<32x1xi32>
    %c0_i32_29 = arith.constant 0 : i32
    %42 = vector.broadcast %c0_i32_29 : i32 to vector<32x1xi32>
    %43 = arith.cmpi ne, %41, %42 : vector<32x1xi32>
    %c0_i32_30 = arith.constant 0 : i32
    %44 = vector.broadcast %c0_i32_30 : i32 to vector<32x1xi32>
    %45 = arith.cmpi slt, %41, %44 : vector<32x1xi32>
    %c0_i32_31 = arith.constant 0 : i32
    %46 = arith.cmpi slt, %39, %c0_i32_31 : i32
    %47 = vector.broadcast %46 : i1 to vector<32x1xi1>
    %48 = vector.broadcast %47 : vector<32x1xi1> to vector<32x1xi1>
    %49 = arith.xori %45, %48 : vector<32x1xi1>
    %50 = arith.andi %49, %43 : vector<32x1xi1>
    %51 = vector.broadcast %39 : i32 to vector<32x1xi32>
    %52 = arith.addi %41, %51 : vector<32x1xi32>
    %53 = arith.select %50, %52, %41 : vector<32x1xi1>, vector<32x1xi32>
    %c0_i32_32 = arith.constant 0 : i32
    %54 = vector.broadcast %c0_i32_32 : i32 to vector<32x1xi32>
    %55 = arith.cmpi eq, %53, %54 : vector<32x1xi32>
    %c7_i32 = arith.constant 7 : i32
    %56 = vector.broadcast %c7_i32 : i32 to vector<32x1xi32>
    %57 = arith.cmpi eq, %53, %56 : vector<32x1xi32>
    %cst_33 = arith.constant 0.000000e+00 : f32
    %58 = vector.broadcast %cst_33 : f32 to vector<32x8xf32>
    %c1_i32_34 = arith.constant 1 : i32
    %59 = tpu.dynamic_rotate %34 by %c1_i32_34 dim 0 : vector<32x8xf32>, i32 -> vector<32x8xf32>
    %60 = vector.shape_cast %55 : vector<32x1xi1> to vector<32x1xi1>
    %61 = vector.broadcast %60 : vector<32x1xi1> to vector<32x8xi1>
    %62 = arith.select %61, %58, %59 : vector<32x8xi1>, vector<32x8xf32>
    %cst_35 = arith.constant 0.000000e+00 : f32
    %63 = vector.broadcast %cst_35 : f32 to vector<32x8xf32>
    %c31_i32 = arith.constant 31 : i32
    %64 = tpu.dynamic_rotate %34 by %c31_i32 dim 0 : vector<32x8xf32>, i32 -> vector<32x8xf32>
    %65 = vector.shape_cast %57 : vector<32x1xi1> to vector<32x1xi1>
    %66 = vector.broadcast %65 : vector<32x1xi1> to vector<32x8xi1>
    %67 = arith.select %66, %63, %64 : vector<32x8xi1>, vector<32x8xf32>
    %cst_36 = arith.constant 0.000000e+00 : f32
    %68 = vector.broadcast %cst_36 : f32 to vector<32x8xf32>
    %c1_i32_37 = arith.constant 1 : i32
    %69 = tpu.dynamic_rotate %8 by %c1_i32_37 dim 0 : vector<32x8xf32>, i32 -> vector<32x8xf32>
    %70 = vector.shape_cast %55 : vector<32x1xi1> to vector<32x1xi1>
    %71 = vector.broadcast %70 : vector<32x1xi1> to vector<32x8xi1>
    %72 = arith.select %71, %68, %69 : vector<32x8xi1>, vector<32x8xf32>
    %cst_38 = arith.constant 0.000000e+00 : f32
    %73 = vector.broadcast %cst_38 : f32 to vector<32x8xf32>
    %c31_i32_39 = arith.constant 31 : i32
    %74 = tpu.dynamic_rotate %8 by %c31_i32_39 dim 0 : vector<32x8xf32>, i32 -> vector<32x8xf32>
    %75 = vector.shape_cast %57 : vector<32x1xi1> to vector<32x1xi1>
    %76 = vector.broadcast %75 : vector<32x1xi1> to vector<32x8xi1>
    %77 = arith.select %76, %73, %74 : vector<32x8xi1>, vector<32x8xf32>
    %cst_40 = arith.constant 0.000000e+00 : f32
    %78 = vector.broadcast %cst_40 : f32 to vector<32x8xf32>
    %c1_i32_41 = arith.constant 1 : i32
    %79 = tpu.dynamic_rotate %36 by %c1_i32_41 dim 0 : vector<32x8xf32>, i32 -> vector<32x8xf32>
    %80 = vector.shape_cast %55 : vector<32x1xi1> to vector<32x1xi1>
    %81 = vector.broadcast %80 : vector<32x1xi1> to vector<32x8xi1>
    %82 = arith.select %81, %78, %79 : vector<32x8xi1>, vector<32x8xf32>
    %cst_42 = arith.constant 0.000000e+00 : f32
    %83 = vector.broadcast %cst_42 : f32 to vector<32x8xf32>
    %c31_i32_43 = arith.constant 31 : i32
    %84 = tpu.dynamic_rotate %36 by %c31_i32_43 dim 0 : vector<32x8xf32>, i32 -> vector<32x8xf32>
    %85 = vector.shape_cast %57 : vector<32x1xi1> to vector<32x1xi1>
    %86 = vector.broadcast %85 : vector<32x1xi1> to vector<32x8xi1>
    %87 = arith.select %86, %83, %84 : vector<32x8xi1>, vector<32x8xf32>
    %cst_44 = arith.constant 0.000000e+00 : f32
    %88 = vector.broadcast %cst_44 : f32 to vector<32x16xf32>
    %c0_45 = arith.constant 0 : index
    %c0_46 = arith.constant 0 : index
    %c0_47 = arith.constant 0 : index
    %89 = vector.load %arg7[%c0_45, %c0_46, %c0_47] : memref<12x8x16xf32, #tpu.memory_space<vmem>>, vector<1x8x16xf32>
    %90 = vector.shape_cast %89 : vector<1x8x16xf32> to vector<8x16xf32>
    %cst_48 = arith.constant dense<0.000000e+00> : vector<32x16xf32>
    %91 = tpu.matmul %62, %90, %cst_48 {dimension_numbers = #tpu.dot_dimension_numbers<[1], [0], [0], [1], [0, 0, 1, 1], [], []>} : vector<32x8xf32>, vector<8x16xf32>, vector<32x16xf32> -> vector<32x16xf32>
    %92 = arith.addf %88, %91 : vector<32x16xf32>
    %c1 = arith.constant 1 : index
    %c0_49 = arith.constant 0 : index
    %c0_50 = arith.constant 0 : index
    %93 = vector.load %arg7[%c1, %c0_49, %c0_50] : memref<12x8x16xf32, #tpu.memory_space<vmem>>, vector<1x8x16xf32>
    %94 = vector.shape_cast %93 : vector<1x8x16xf32> to vector<8x16xf32>
    %cst_51 = arith.constant dense<0.000000e+00> : vector<32x16xf32>
    %95 = tpu.matmul %34, %94, %cst_51 {dimension_numbers = #tpu.dot_dimension_numbers<[1], [0], [0], [1], [0, 0, 1, 1], [], []>} : vector<32x8xf32>, vector<8x16xf32>, vector<32x16xf32> -> vector<32x16xf32>
    %96 = arith.addf %92, %95 : vector<32x16xf32>
    %c2 = arith.constant 2 : index
    %c0_52 = arith.constant 0 : index
    %c0_53 = arith.constant 0 : index
    %97 = vector.load %arg7[%c2, %c0_52, %c0_53] : memref<12x8x16xf32, #tpu.memory_space<vmem>>, vector<1x8x16xf32>
    %98 = vector.shape_cast %97 : vector<1x8x16xf32> to vector<8x16xf32>
    %cst_54 = arith.constant dense<0.000000e+00> : vector<32x16xf32>
    %99 = tpu.matmul %67, %98, %cst_54 {dimension_numbers = #tpu.dot_dimension_numbers<[1], [0], [0], [1], [0, 0, 1, 1], [], []>} : vector<32x8xf32>, vector<8x16xf32>, vector<32x16xf32> -> vector<32x16xf32>
    %100 = arith.addf %96, %99 : vector<32x16xf32>
    %c3 = arith.constant 3 : index
    %c0_55 = arith.constant 0 : index
    %c0_56 = arith.constant 0 : index
    %101 = vector.load %arg7[%c3, %c0_55, %c0_56] : memref<12x8x16xf32, #tpu.memory_space<vmem>>, vector<1x8x16xf32>
    %102 = vector.shape_cast %101 : vector<1x8x16xf32> to vector<8x16xf32>
    %cst_57 = arith.constant dense<0.000000e+00> : vector<32x16xf32>
    %103 = tpu.matmul %72, %102, %cst_57 {dimension_numbers = #tpu.dot_dimension_numbers<[1], [0], [0], [1], [0, 0, 1, 1], [], []>} : vector<32x8xf32>, vector<8x16xf32>, vector<32x16xf32> -> vector<32x16xf32>
    %104 = arith.addf %100, %103 : vector<32x16xf32>
    %c4 = arith.constant 4 : index
    %c0_58 = arith.constant 0 : index
    %c0_59 = arith.constant 0 : index
    %105 = vector.load %arg7[%c4, %c0_58, %c0_59] : memref<12x8x16xf32, #tpu.memory_space<vmem>>, vector<1x8x16xf32>
    %106 = vector.shape_cast %105 : vector<1x8x16xf32> to vector<8x16xf32>
    %cst_60 = arith.constant dense<0.000000e+00> : vector<32x16xf32>
    %107 = tpu.matmul %8, %106, %cst_60 {dimension_numbers = #tpu.dot_dimension_numbers<[1], [0], [0], [1], [0, 0, 1, 1], [], []>} : vector<32x8xf32>, vector<8x16xf32>, vector<32x16xf32> -> vector<32x16xf32>
    %108 = arith.addf %104, %107 : vector<32x16xf32>
    %c5 = arith.constant 5 : index
    %c0_61 = arith.constant 0 : index
    %c0_62 = arith.constant 0 : index
    %109 = vector.load %arg7[%c5, %c0_61, %c0_62] : memref<12x8x16xf32, #tpu.memory_space<vmem>>, vector<1x8x16xf32>
    %110 = vector.shape_cast %109 : vector<1x8x16xf32> to vector<8x16xf32>
    %cst_63 = arith.constant dense<0.000000e+00> : vector<32x16xf32>
    %111 = tpu.matmul %77, %110, %cst_63 {dimension_numbers = #tpu.dot_dimension_numbers<[1], [0], [0], [1], [0, 0, 1, 1], [], []>} : vector<32x8xf32>, vector<8x16xf32>, vector<32x16xf32> -> vector<32x16xf32>
    %112 = arith.addf %108, %111 : vector<32x16xf32>
    %c0_64 = arith.constant 0 : index
    %c0_65 = arith.constant 0 : index
    %113 = vector.load %arg8[%c0_64, %c0_65] : memref<1x16xf32, #tpu.memory_space<vmem>>, vector<1x16xf32>
    %114 = vector.broadcast %113 : vector<1x16xf32> to vector<32x16xf32>
    %115 = arith.addf %112, %114 : vector<32x16xf32>
    %cst_66 = arith.constant 0.000000e+00 : f32
    %116 = vector.broadcast %cst_66 : f32 to vector<32x16xf32>
    %117 = arith.maximumf %115, %116 : vector<32x16xf32>
    %c0_67 = arith.constant 0 : index
    %c0_68 = arith.constant 0 : index
    %118 = vector.load %arg9[%c0_67, %c0_68] : memref<16x32xf32, #tpu.memory_space<vmem>>, vector<16x32xf32>
    %cst_69 = arith.constant dense<0.000000e+00> : vector<32x32xf32>
    %119 = tpu.matmul %117, %118, %cst_69 {dimension_numbers = #tpu.dot_dimension_numbers<[1], [0], [0], [1], [0, 0, 1, 1], [], []>} : vector<32x16xf32>, vector<16x32xf32>, vector<32x32xf32> -> vector<32x32xf32>
    %c0_70 = arith.constant 0 : index
    %c0_71 = arith.constant 0 : index
    %120 = vector.load %arg10[%c0_70, %c0_71] : memref<1x32xf32, #tpu.memory_space<vmem>>, vector<1x32xf32>
    %121 = vector.broadcast %120 : vector<1x32xf32> to vector<32x32xf32>
    %122 = arith.addf %119, %121 : vector<32x32xf32>
    %cst_72 = arith.constant 0.000000e+00 : f32
    %123 = vector.broadcast %cst_72 : f32 to vector<32x32xf32>
    %124 = arith.maximumf %122, %123 : vector<32x32xf32>
    %125 = vector.shape_cast %124 : vector<32x32xf32> to vector<4x8x32xf32>
    %c0_73 = arith.constant 0 : index
    %c0_74 = arith.constant 0 : index
    %c0_75 = arith.constant 0 : index
    %c0_76 = arith.constant 0 : index
    %c0_77 = arith.constant 0 : index
    %126 = vector.load %arg11[%c0_73, %c0_74, %c0_75, %c0_76, %c0_77] : memref<1x4x2x8x32xf32, #tpu.memory_space<vmem>>, vector<1x4x1x8x32xf32>
    %127 = vector.shape_cast %126 : vector<1x4x1x8x32xf32> to vector<4x8x32xf32>
    %128 = arith.addf %125, %127 : vector<4x8x32xf32>
    %c0_78 = arith.constant 0 : index
    %c0_79 = arith.constant 0 : index
    %c0_80 = arith.constant 0 : index
    %c0_81 = arith.constant 0 : index
    %c0_82 = arith.constant 0 : index
    %129 = vector.load %arg12[%c0_78, %c0_79, %c0_80, %c0_81, %c0_82] : memref<1x4x2x8x32xf32, #tpu.memory_space<vmem>>, vector<1x4x1x8x32xf32>
    %130 = vector.shape_cast %129 : vector<1x4x1x8x32xf32> to vector<4x8x32xf32>
    %131 = vector.shape_cast %128 : vector<4x8x32xf32> to vector<1x4x1x8x32xf32>
    tpu.vector_store %arg12[%c0_78, %c0_79, %c0_80, %c0_81, %c0_82], %131 {strides = array<i32>} : memref<1x4x2x8x32xf32, #tpu.memory_space<vmem>>, vector<1x4x1x8x32xf32>,
    %cst_83 = arith.constant 0.000000e+00 : f32
    %132 = vector.broadcast %cst_83 : f32 to vector<32x16xf32>
    %c6 = arith.constant 6 : index
    %c0_84 = arith.constant 0 : index
    %c0_85 = arith.constant 0 : index
    %133 = vector.load %arg7[%c6, %c0_84, %c0_85] : memref<12x8x16xf32, #tpu.memory_space<vmem>>, vector<1x8x16xf32>
    %134 = vector.shape_cast %133 : vector<1x8x16xf32> to vector<8x16xf32>
    %cst_86 = arith.constant dense<0.000000e+00> : vector<32x16xf32>
    %135 = tpu.matmul %72, %134, %cst_86 {dimension_numbers = #tpu.dot_dimension_numbers<[1], [0], [0], [1], [0, 0, 1, 1], [], []>} : vector<32x8xf32>, vector<8x16xf32>, vector<32x16xf32> -> vector<32x16xf32>
    %136 = arith.addf %132, %135 : vector<32x16xf32>
    %c7 = arith.constant 7 : index
    %c0_87 = arith.constant 0 : index
    %c0_88 = arith.constant 0 : index
    %137 = vector.load %arg7[%c7, %c0_87, %c0_88] : memref<12x8x16xf32, #tpu.memory_space<vmem>>, vector<1x8x16xf32>
    %138 = vector.shape_cast %137 : vector<1x8x16xf32> to vector<8x16xf32>
    %cst_89 = arith.constant dense<0.000000e+00> : vector<32x16xf32>
    %139 = tpu.matmul %8, %138, %cst_89 {dimension_numbers = #tpu.dot_dimension_numbers<[1], [0], [0], [1], [0, 0, 1, 1], [], []>} : vector<32x8xf32>, vector<8x16xf32>, vector<32x16xf32> -> vector<32x16xf32>
    %140 = arith.addf %136, %139 : vector<32x16xf32>
    %c8 = arith.constant 8 : index
    %c0_90 = arith.constant 0 : index
    %c0_91 = arith.constant 0 : index
    %141 = vector.load %arg7[%c8, %c0_90, %c0_91] : memref<12x8x16xf32, #tpu.memory_space<vmem>>, vector<1x8x16xf32>
    %142 = vector.shape_cast %141 : vector<1x8x16xf32> to vector<8x16xf32>
    %cst_92 = arith.constant dense<0.000000e+00> : vector<32x16xf32>
    %143 = tpu.matmul %77, %142, %cst_92 {dimension_numbers = #tpu.dot_dimension_numbers<[1], [0], [0], [1], [0, 0, 1, 1], [], []>} : vector<32x8xf32>, vector<8x16xf32>, vector<32x16xf32> -> vector<32x16xf32>
    %144 = arith.addf %140, %143 : vector<32x16xf32>
    %c9 = arith.constant 9 : index
    %c0_93 = arith.constant 0 : index
    %c0_94 = arith.constant 0 : index
    %145 = vector.load %arg7[%c9, %c0_93, %c0_94] : memref<12x8x16xf32, #tpu.memory_space<vmem>>, vector<1x8x16xf32>
    %146 = vector.shape_cast %145 : vector<1x8x16xf32> to vector<8x16xf32>
    %cst_95 = arith.constant dense<0.000000e+00> : vector<32x16xf32>
    %147 = tpu.matmul %82, %146, %cst_95 {dimension_numbers = #tpu.dot_dimension_numbers<[1], [0], [0], [1], [0, 0, 1, 1], [], []>} : vector<32x8xf32>, vector<8x16xf32>, vector<32x16xf32> -> vector<32x16xf32>
    %148 = arith.addf %144, %147 : vector<32x16xf32>
    %c10 = arith.constant 10 : index
    %c0_96 = arith.constant 0 : index
    %c0_97 = arith.constant 0 : index
    %149 = vector.load %arg7[%c10, %c0_96, %c0_97] : memref<12x8x16xf32, #tpu.memory_space<vmem>>, vector<1x8x16xf32>
    %150 = vector.shape_cast %149 : vector<1x8x16xf32> to vector<8x16xf32>
    %cst_98 = arith.constant dense<0.000000e+00> : vector<32x16xf32>
    %151 = tpu.matmul %36, %150, %cst_98 {dimension_numbers = #tpu.dot_dimension_numbers<[1], [0], [0], [1], [0, 0, 1, 1], [], []>} : vector<32x8xf32>, vector<8x16xf32>, vector<32x16xf32> -> vector<32x16xf32>
    %152 = arith.addf %148, %151 : vector<32x16xf32>
    %c11 = arith.constant 11 : index
    %c0_99 = arith.constant 0 : index
    %c0_100 = arith.constant 0 : index
    %153 = vector.load %arg7[%c11, %c0_99, %c0_100] : memref<12x8x16xf32, #tpu.memory_space<vmem>>, vector<1x8x16xf32>
    %154 = vector.shape_cast %153 : vector<1x8x16xf32> to vector<8x16xf32>
    %cst_101 = arith.constant dense<0.000000e+00> : vector<32x16xf32>
    %155 = tpu.matmul %87, %154, %cst_101 {dimension_numbers = #tpu.dot_dimension_numbers<[1], [0], [0], [1], [0, 0, 1, 1], [], []>} : vector<32x8xf32>, vector<8x16xf32>, vector<32x16xf32> -> vector<32x16xf32>
    %156 = arith.addf %152, %155 : vector<32x16xf32>
    %c0_102 = arith.constant 0 : index
    %c0_103 = arith.constant 0 : index
    %157 = vector.load %arg8[%c0_102, %c0_103] : memref<1x16xf32, #tpu.memory_space<vmem>>, vector<1x16xf32>
    %158 = vector.broadcast %157 : vector<1x16xf32> to vector<32x16xf32>
    %159 = arith.addf %156, %158 : vector<32x16xf32>
    %cst_104 = arith.constant 0.000000e+00 : f32
    %160 = vector.broadcast %cst_104 : f32 to vector<32x16xf32>
    %161 = arith.maximumf %159, %160 : vector<32x16xf32>
    %c0_105 = arith.constant 0 : index
    %c0_106 = arith.constant 0 : index
    %162 = vector.load %arg9[%c0_105, %c0_106] : memref<16x32xf32, #tpu.memory_space<vmem>>, vector<16x32xf32>
    %cst_107 = arith.constant dense<0.000000e+00> : vector<32x32xf32>
    %163 = tpu.matmul %161, %162, %cst_107 {dimension_numbers = #tpu.dot_dimension_numbers<[1], [0], [0], [1], [0, 0, 1, 1], [], []>} : vector<32x16xf32>, vector<16x32xf32>, vector<32x32xf32> -> vector<32x32xf32>
    %c0_108 = arith.constant 0 : index
    %c0_109 = arith.constant 0 : index
    %164 = vector.load %arg10[%c0_108, %c0_109] : memref<1x32xf32, #tpu.memory_space<vmem>>, vector<1x32xf32>
    %165 = vector.broadcast %164 : vector<1x32xf32> to vector<32x32xf32>
    %166 = arith.addf %163, %165 : vector<32x32xf32>
    %cst_110 = arith.constant 0.000000e+00 : f32
    %167 = vector.broadcast %cst_110 : f32 to vector<32x32xf32>
    %168 = arith.maximumf %166, %167 : vector<32x32xf32>
    %169 = vector.shape_cast %168 : vector<32x32xf32> to vector<4x8x32xf32>
    %c0_111 = arith.constant 0 : index
    %c0_112 = arith.constant 0 : index
    %c1_113 = arith.constant 1 : index
    %c0_114 = arith.constant 0 : index
    %c0_115 = arith.constant 0 : index
    %170 = vector.load %arg11[%c0_111, %c0_112, %c1_113, %c0_114, %c0_115] : memref<1x4x2x8x32xf32, #tpu.memory_space<vmem>>, vector<1x4x1x8x32xf32>
    %171 = vector.shape_cast %170 : vector<1x4x1x8x32xf32> to vector<4x8x32xf32>
    %172 = arith.addf %169, %171 : vector<4x8x32xf32>
    %c0_116 = arith.constant 0 : index
    %c0_117 = arith.constant 0 : index
    %c1_118 = arith.constant 1 : index
    %c0_119 = arith.constant 0 : index
    %c0_120 = arith.constant 0 : index
    %173 = vector.load %arg12[%c0_116, %c0_117, %c1_118, %c0_119, %c0_120] : memref<1x4x2x8x32xf32, #tpu.memory_space<vmem>>, vector<1x4x1x8x32xf32>
    %174 = vector.shape_cast %173 : vector<1x4x1x8x32xf32> to vector<4x8x32xf32>
    %175 = vector.shape_cast %172 : vector<4x8x32xf32> to vector<1x4x1x8x32xf32>
    tpu.vector_store %arg12[%c0_116, %c0_117, %c1_118, %c0_119, %c0_120], %175 {strides = array<i32>} : memref<1x4x2x8x32xf32, #tpu.memory_space<vmem>>, vector<1x4x1x8x32xf32>,
    return
  }
  func.func @transform_0(%arg0: i32, %arg1: i32) -> (i32, i32, i32) {
    %c0_i32 = arith.constant 0 : i32
    %c0_i32_0 = arith.constant 0 : i32
    return %arg0, %arg1, %c0_i32 : i32, i32, i32
  }
  func.func @transform_1(%arg0: i32, %arg1: i32) -> (i32, i32, i32) {
    %c4_i32 = arith.constant 4 : i32
    %0 = arith.muli %arg1, %c4_i32 : i32
    %c1_i32 = arith.constant 1 : i32
    %1 = arith.subi %0, %c1_i32 : i32
    %c0_i32 = arith.constant 0 : i32
    %2 = arith.maxsi %1, %c0_i32 : i32
    %c0_i32_0 = arith.constant 0 : i32
    %c0_i32_1 = arith.constant 0 : i32
    return %arg0, %2, %c0_i32_0 : i32, i32, i32
  }
  func.func @transform_2(%arg0: i32, %arg1: i32) -> (i32, i32, i32) {
    %c1_i32 = arith.constant 1 : i32
    %0 = arith.addi %arg1, %c1_i32 : i32
    %c4_i32 = arith.constant 4 : i32
    %1 = arith.muli %0, %c4_i32 : i32
    %c7_i32 = arith.constant 7 : i32
    %2 = arith.minsi %1, %c7_i32 : i32
    %c0_i32 = arith.constant 0 : i32
    %c0_i32_0 = arith.constant 0 : i32
    return %arg0, %2, %c0_i32 : i32, i32, i32
  }
  func.func @transform_3(%arg0: i32, %arg1: i32) -> (i32, i32) {
    %c0_i32 = arith.constant 0 : i32
    %c0_i32_0 = arith.constant 0 : i32
    %c0_i32_1 = arith.constant 0 : i32
    return %c0_i32, %c0_i32_0 : i32, i32
  }
  func.func @transform_4(%arg0: i32, %arg1: i32) -> (i32, i32) {
    %c0_i32 = arith.constant 0 : i32
    %c0_i32_0 = arith.constant 0 : i32
    %c0_i32_1 = arith.constant 0 : i32
    return %c0_i32, %c0_i32_0 : i32, i32
  }
  func.func @transform_5(%arg0: i32, %arg1: i32) -> (i32, i32, i32) {
    %c0_i32 = arith.constant 0 : i32
    %c0_i32_0 = arith.constant 0 : i32
    %c0_i32_1 = arith.constant 0 : i32
    %c0_i32_2 = arith.constant 0 : i32
    return %c0_i32, %c0_i32_0, %c0_i32_1 : i32, i32, i32
  }
  func.func @transform_6(%arg0: i32, %arg1: i32) -> (i32, i32) {
    %c0_i32 = arith.constant 0 : i32
    %c0_i32_0 = arith.constant 0 : i32
    %c0_i32_1 = arith.constant 0 : i32
    return %c0_i32, %c0_i32_0 : i32, i32
  }
  func.func @transform_7(%arg0: i32, %arg1: i32) -> (i32, i32) {
    %c0_i32 = arith.constant 0 : i32
    %c0_i32_0 = arith.constant 0 : i32
    %c0_i32_1 = arith.constant 0 : i32
    return %c0_i32, %c0_i32_0 : i32, i32
  }
  func.func @transform_8(%arg0: i32, %arg1: i32) -> (i32, i32) {
    %c0_i32 = arith.constant 0 : i32
    %c0_i32_0 = arith.constant 0 : i32
    %c0_i32_1 = arith.constant 0 : i32
    return %c0_i32, %c0_i32_0 : i32, i32
  }
  func.func @transform_9(%arg0: i32, %arg1: i32) -> (i32, i32, i32, i32, i32) {
    %c0_i32 = arith.constant 0 : i32
    %c0_i32_0 = arith.constant 0 : i32
    %c0_i32_1 = arith.constant 0 : i32
    %c0_i32_2 = arith.constant 0 : i32
    return %arg0, %arg1, %c0_i32, %c0_i32_0, %c0_i32_1 : i32, i32, i32, i32, i32
  }
  func.func @transform_10(%arg0: i32, %arg1: i32) -> (i32, i32, i32, i32, i32) {
    %c0_i32 = arith.constant 0 : i32
    %c0_i32_0 = arith.constant 0 : i32
    %c0_i32_1 = arith.constant 0 : i32
    %c0_i32_2 = arith.constant 0 : i32
    return %arg0, %arg1, %c0_i32, %c0_i32_0, %c0_i32_1 : i32, i32, i32, i32, i32
  }
}

</mosaic_0001>

<bundles_post_ra>
// kernel: tpu_custom_call.1
= control target key start
LH: loop header
LB: loop body
LE: loop exit
PB: predicated region body
PF: predicated region fallthrough
CT: control target
= control target key end

     0   :  { %s3845_s0 = inlined_call_operand.vmem [shape: f32[2,64,32], index: 0, kind: input, shape index: {}]   ;;  %s3846_s1 = inlined_call_operand.vmem [shape: f32[2,64,32], index: 1, kind: input, shape index: {}]   ;;  %s3847_s2 = inlined_call_operand.vmem [shape: f32[2,64,32], index: 2, kind: input, shape index: {}]   ;;  %s3848_s3 = inlined_call_operand.vmem [shape: f32[32,8], index: 3, kind: input, shape index: {}]   ;;  %s3849_s4 = inlined_call_operand.vmem [shape: f32[1,8], index: 4, kind: input, shape index: {}]   ;;  %s3850_s5 = inlined_call_operand.vmem [shape: f32[12,8,16], index: 5, kind: input, shape index: {}]   ;;  %s3851_s6 = inlined_call_operand.vmem [shape: f32[1,16], index: 6, kind: input, shape index: {}]   ;;  %s3852_s7 = inlined_call_operand.vmem [shape: f32[16,32], index: 7, kind: input, shape index: {}]   ;;  %s3853_s8 = inlined_call_operand.vmem [shape: f32[1,32], index: 8, kind: input, shape index: {}]   ;;  %s3854_s9 = inlined_call_operand.vmem [shape: f32[2,8,2,8,32], index: 9, kind: input, shape index: {}]   ;;  %s3855_s10 = inlined_call_operand.hbm [shape: f32[2,8,2,8,32], index: 10, kind: output, shape index: {}]  }
   0x1   :  { %3860 = sst [smem:[#allocation10_spill]] %s3848_s3 }
   0x2   :  { %15 = vsyncpa [#allocation3], 0 }
   0x3   :  { %17 = vsyncpa [#allocation3 + $0x1], 0  ;;  %s3234_s13 = smov 0   ;;  %s3236_s14 = smov 0  }
   0x4   :  { %s3238_s15 = smov 0   ;;  %s3240_s16 = smov 0  }
   0x5   :  { %s3242_s17 = smov 0   ;;  %s3244_s18 = smov 0  }
   0x6   :  { %s3246_s19 = smov 0   ;;  %s3248_s20 = smov 0  }
   0x7 LB: > { %3861 = sst [smem:[#allocation5_spill]] %s3163_s18  ;;  %s2553_s21 = sadd.s32 4294967295, %s3171_s20   ;;  %s3171_s20 = sphi %s3248_s20, %s23_s20   ;;  %s3167_s19 = sphi %s3246_s19, %s3894_s19   ;;  %s3163_s18 = sphi %s3244_s18, %s3893_s18   ;;  %s3159_s17 = sphi %s3242_s17, %s3892_s17   ;;  %s3155_s16 = sphi %s3240_s16, %s3891_s16   ;;  %s3151_s15 = sphi %s3238_s15, %s3897_s15   ;;  %s3147_s14 = sphi %s3236_s14, %s3896_s14   ;;  %s3143_s13 = sphi %s3234_s13, %s3895_s13  }
   0x8   : > { %3862 = sst [smem:[#allocation6_spill]] %s3167_s19  ;;  %s2554_s22 = sadd.s32 4294967294, %s3171_s20  }
   0x9   : > { %s32_s23 = sadd.s32 1, %s3163_s18  ;;  %s35_s24 = sadd.s32 1, %s3167_s19 }
   0xa   : > { %p33_p0 = scmp.ge.s32.totalorder %s32_s23, 2  ;;  %p308_p1 = scmp.ne.s32.totalorder %s3151_s15, %s3147_s14 }
   0xb   : > { %p309_p2 = scmp.eq.s32.totalorder %s2553_s21, 3  ;;  %p314_p5 = scmp.ne.s32.totalorder %s3147_s14, %s3143_s13 }
   0xc   : > { %s3899_s23 = smov (%p33_p0, %s32_s23), 0  ;;  %s3901_s24 = smov (!%p33_p0, %s35_s24), %s3167_s19 }
   0xd   : > { %3863 = sst [smem:[#allocation7_spill]] %s3899_s23  ;;  %s294_s25 = ssub.s32 %s3163_s18, %s3899_s23 }
   0xe   : > { %p3285_p3 = por %p309_p2, %p308_p1  ;;  %p37_p4 = scmp.ge.s32.totalorder %s3901_s24, 2 }
   0xf   : > { %p315_p6 = scmp.eq.s32.totalorder %s2554_s22, 3  ;;  %p2563_p7 = scmp.ge.s32.totalorder %s3171_s20, 1 }
  0x10   : > { %s3903_s24 = smov (%p37_p4, %s3901_s24), 0  ;;  %p416_p9 = scmp.lt.s32.totalorder %s3171_s20, 5 }
  0x11   : > { %3865 = sst [smem:[#allocation8_spill]] %s3903_s24  ;;  %p3294_p8 = por %p315_p6, %p314_p5 }
  0x12   : > { %s293_s28 = ssub.s32 %s3167_s19, %s3903_s24  ;;  %s298_s29 = sadd.s32 1, %s3151_s15 }
  0x13   : > { %s295_s30 = sor.u32 %s294_s25, %s293_s28  ;;  %p417_p10 = pnand %p2563_p7, %p416_p9 }
  0x14   : > { %p296_p11 = scmp.eq.s32.totalorder %s295_s30, 0  ;;  %s3868_s3 = sld [smem:[#allocation10_spill]] (!%p417_p10)  ;;  %v3173_v4 = vmov (!%p417_p10), 0.0|0.0   ;;  %vm3174_vm0 = vmmov (!%p417_p10), 0   ;;  %v3175_v7 = vmov (!%p417_p10), 0.0   ;;  %vm561_vm1 = vcmask (!%p417_p10), 261120  }
  0x15   : > { %420 = sbr.rel (%p417_p10) target bundleno = 1016 (0x3f8), region = 60  ;;  %s3315_s25 = sshll.u32 (!%p417_p10), %s3155_s16, 2  ;;  %2939 = vmatprep.subr.bf16.mxu1 (!%p417_p10), %v3173_v4  ;;  %2801 = vmatprep.mubr.msk.f32.mxu1 (!%p417_p10), %vm3174_vm0, %v3175_v7  ;;  %v2594_v14 = vld [vmem:[%s3850_s5 + $0x8] sm:$0xff] (!%p417_p10)  ;;  %v954_v15 = vld [vmem:[%s3850_s5] sm:$0xff] (!%p417_p10)  ;;  %v823_v16 = vlaneseq (!%p417_p10)  ;;  %vm957_vm3 = vcmask (!%p417_p10), 64512   ;;  %v2603_v57 = vld [vmem:[%s3850_s5 + $0x10] sm:$0xff] (!%p417_p10) }
  0x16   : > { %s3303_s11 = scalar_select %p296_p11, %s3151_s15, %s298_s29  }
  0x17   : > { %p493_p12 = scmp.lt.s32.totalorder (!%p417_p10), %s3159_s17, 1  ;;  %p495_p13 = scmp.lt.s32.totalorder (!%p417_p10), %s3315_s25, 7  ;;  %v3370_v17 = vshrl.u32 (!%p417_p10), %v823_v16, 7  ;;  %v2587_v18 = vld [vmem:[%s3849_s4] ss:$0 sm:$0xff] (!%p417_p10)  ;;  %vm1579_vm15 = vcmask (!%p417_p10), 130048  }
  0x18   : > { %3867 = sst [smem:[#allocation9_spill]] %s3303_s11  ;;  %s3323_s23 = sadd.s32 (!%p417_p10), 4294967295, %s3315_s25 }
  0x19   : > { %p504_p0 = scmp.gt.s32.totalorder (!%p417_p10), %s3323_s23, 0  ;;  %p2570_p1 = scmp.lt.s32.totalorder (!%p417_p10), %s3323_s23, 7  ;;  %v825_v22 = vadd.s32 (!%p417_p10), 8, %v3370_v17  ;;  %v826_v23 = vadd.s32 (!%p417_p10), 16, %v3370_v17  ;;  %v827_v35 = vadd.s32 (!%p417_p10), 24, %v3370_v17  ;;  %v832_v41 = vand.u32 (!%p417_p10), 7, %v3370_v17 }
  0x1a   : > { %v550_v0 = vld [vmem:[%s3868_s3] sm:$0xff] (!%p417_p10)  ;;  %v551_v1 = vld [vmem:[%s3868_s3 + $0x8] sm:$0xff] (!%p417_p10)  ;;  %v552_v2 = vld [vmem:[%s3868_s3 + $0x10] sm:$0xff] (!%p417_p10)  ;;  %p813_p4 = scmp.eq.s32.totalorder (!%p417_p10), %s3155_s16, 0  ;;  %p818_p5 = scmp.eq.s32.totalorder (!%p417_p10), %s3155_s16, 1  ;;  %vm888_vm4 = vcmp.lt.s32.totalorder (!%p417_p10), %v3370_v17, 1 }
  0x1b   : > { %v2931_v3 = vpack.c.bf16 (!%p417_p10), %v551_v1, %v550_v0  ;;  %v553_v5 = vld [vmem:[%s3868_s3 + $0x18] sm:$0xff] (!%p417_p10)  ;;  %v839_v31 = vand.u32 (!%p417_p10), 7, %v825_v22  ;;  %v846_v34 = vand.u32 (!%p417_p10), 7, %v826_v23  ;;  %vm909_vm5 = vcmp.lt.s32.totalorder (!%p417_p10), %v3370_v17, 7 }
  0x1c   : > { %v2935_v6 = vpack.c.bf16 %v553_v5, %v552_v2  ;;  %s494_s30 = scalar_select %p493_p12, %s3159_s17, 1  ;;  %vm3403_vm7 = vcmp.eq.s32.totalorder %v832_v41, 0  ;;  %v853_v49 = vand.u32 7, %v827_v35  ;;  %vm3444_vm10 = vcmp.eq.s32.totalorder %v832_v41, 7  ;;  %v2630_v17 = vld [vmem:[%s3850_s5 + $0x38] sm:$0xff] }
  0x1d   : > { %2932 = vmatprep.subr.bf16.mxu0 %v2931_v3  ;;  %2941 = vmatpush3.bf16.msra.mxu1 %v2931_v3  ;;  %s496_s18 = scalar_select %p495_p13, %s3315_s25, 7  ;;  %vm3397_vm6 = vcmp.eq.s32.totalorder %v839_v31, 0  ;;  %vm3407_vm8 = vcmp.eq.s32.totalorder %v846_v34, 0  ;;  %vm3453_vm11 = vcmp.eq.s32.totalorder %v839_v31, 7  ;;  %vm3467_vm14 = vcmp.eq.s32.totalorder %v846_v34, 7 }
  0x1e   : > { %2934 = vmatpush3.bf16.msra.mxu0 %v2931_v3  ;;  %2942 = vmatprep.subr.bf16.mxu1 %v3173_v4  ;;  %s3328_s24 = sshll.u32 %s494_s30, 3  ;;  %s2585_s12 = sshll.u32 %s494_s30, 4  ;;  %vm3457_vm12 = vcmp.eq.s32.totalorder %v853_v49, 7  ;;  %vm3463_vm13 = vcmp.eq.s32.totalorder %v853_v49, 0 }
  0x1f   : > { %2936 = vmatprep.subr.bf16.mxu0 %v2935_v6  ;;  %s498_s21 = sadd.s32 %s3328_s24, %s496_s18  ;;  %s2584_s22 = sshll.u32 %s496_s18, 1 }
  0x20   : > { %s2567_s28 = sshll.u32 %s498_s21, 3  ;;  %s3331_s29 = sadd.s32 %s2585_s12, %s2584_s22 }
  0x21   : > { %2944 = vmatpush3.bf16.msra.mxu1 %v2935_v6  ;;  %s500_s11 = scalar_lea.vmem %s3845_s0, %s2567_s28  ;;  %s2687_s30 = sadd.s32 4, %s3315_s25 }
  0x22   : > { %2938 = vmatpush3.bf16.msra.mxu0 %v2935_v6  ;;  %v546_v8 = vld [vmem:[%s500_s11] sm:$0xff]  ;;  %v547_v9 = vld [vmem:[%s500_s11 + $0x8] sm:$0xff]  ;;  %v548_v10 = vld [vmem:[%s500_s11 + $0x10] sm:$0xff]  ;;  %s3905_s23 = smov (!%p504_p0, %s3323_s23), 0  ;;  %p3342_p2 = scmp.lt.s32.totalorder %s2687_s30, 7  ;;  %2815 = vmatprep.subr.mxu1 %v2594_v14 }
  0x23   : > { %2787 = vmatprep.mubr.msk.f32.mxu0 %vm561_vm1, %v546_v8  ;;  %2945 = vmatprep.subr.bf16.mxu0 %v3173_v4  ;;  %s3907_s23 = smov (!%p2570_p1, %s3905_s23), 7  ;;  %v549_v11 = vld [vmem:[%s500_s11 + $0x18] sm:$0xff]  ;;  %s3176_s12 = smov [#allocation2]  }
  0x24   : > { %s3909_s30 = smov (!%p3342_p2, %s2687_s30), 7  ;;  %s511_s3 = sadd.s32 %s3907_s23, %s3328_s24 }
  0x25   : > { %2788 = vmatmul.mubr.msk.f32.vlgmr.msra.gmra.mrb[0].mxu0 %vm561_vm1, %v547_v9  ;;  %s2576_s19 = sshll.u32 %s511_s3, 3  ;;  %s3911_s30 = smov (!%p3342_p2, %s3909_s30), 7 }
  0x26   : > { %2947 = vmatpush3.bf16.msra.mxu0 %v2931_v3  ;;  %2790 = vmatprep.mubr.msk.f32.mxu0 %vm561_vm1, %v548_v10  ;;  %s513_s21 = scalar_lea.vmem %s3846_s1, %s2576_s19  ;;  %s527_s11 = sadd.s32 %s3328_s24, %s3911_s30 }
  0x27   : > { %2948 = vmatprep.subr.bf16.mxu0 %v3173_v4  ;;  %v663_v12 = vld [vmem:[%s513_s21] sm:$0xff]  ;;  %s2582_s22 = sshll.u32 %s527_s11, 3  ;;  %s2586_s23 = sshll.u32 %s3331_s29, 3 }
  0x28   : > { %2802 = vmatmul.mubr.msk.f32.vlgmr.msra.gmra.mrb[0].mxu1 %vm561_vm1, %v663_v12  ;;  %s529_s3 = scalar_lea.vmem %s3847_s2, %s2582_s22  ;;  %s3743_s24 = scalar_lea.vmem %s3854_s9, %s2586_s23 }
  0x29   : > { %2791 = vmatmul.mubr.msk.f32.gmra.mrb[2].mxu0 %vm561_vm1, %v549_v11  ;;  %v738_v13 = vld [vmem:[%s529_s3] sm:$0xff]  ;;  %2816 = vmatpush3.msra.mxu1 %v2594_v14  ;;  %s814_s21 = scalar_select %p813_p4, 1, 0  ;;  %v1682_v47 = vld [vmem:[%s3743_s24 + $0x10] sm:$0xff] }
  0x2a   : > { %2950 = vmatpush3.bf16.msra.mxu0 %v2935_v6  ;;  %2812 = vmatprep.mubr.msk.f32.mxu0 %vm3174_vm0, %v3175_v7  ;;  %s3384_s11 = scalar_select %p818_p5, 1, 0 }
  0x2b   : > { %2823 = vmatprep.subr.mxu1 %v954_v15  ;;  %v815_v25 = vstv %s814_s21  ;;  %s489_s3 = sand.u32 1, %s3147_s14   ;;  %s2688_s21 = sshll.u32 %s3155_s16, 3 }
  0x2c   : > { %vm3380_vm2 = vcmp.eq.s32.totalorder %v815_v25, 1  ;;  %v820_v46 = vstv %s3384_s11  ;;  %s2564_s30 = sshll.u32 %s489_s3, 6  ;;  %s2676_s11 = sshll.u32 %s3159_s17, 4 }
  0x2d   : > { %2813 = vmatmul.mubr.msk.f32.vlgmr.msra.gmra.mrb[4].mxu0 %vm561_vm1, %v738_v13  ;;  %vm3435_vm9 = vcmp.eq.s32.totalorder %v820_v46, 1  ;;  %s3750_s29 = scalar_lea.vmem [#allocation2], %s2564_s30  ;;  %s2411_s22 = sadd.s32 %s2688_s21, %s2676_s11 }
  0x2e   : > { %s2677_s16 = sshll.u32 %s2411_s22, 7  ;;  %s2414_s17 = sshll.u32 %s3750_s29, 4  ;;  %s3785_s17 = int_to_ptr.vmem [resolvable:$true] %s2414_s17 }
  0x2f   : > { %s3783_s19 = scalar_lea.hbm %s3855_s10, %s2677_s16  ;;  %s3793_s25 = scalar_lea.sflag [#allocation3], %s489_s3 }
  0x30   : > { %s3077_s18 = scalar_lea.vmem %s3785_s17, 1024 }
  0x31   : > { %p3078_p6 = scmp.ne.s32.totalorder %s3785_s17, %s3077_s18 }
  0x33   : > { %p3079_p7 = pnand %p3078_p6, %p3285_p3 }
  0x35   : > { %p3080_p9 = pneg %p3079_p7 }
  0xf8   : > { %v2789_v19 = vpop.f32.mrb[0].mxu0 }
  0xf9   : > { %v640_v20 = vpop.f32.mrb[1].mxu0  ;;  %v646_v21 = vadd.f32 %v2789_v19, %v2587_v18 }
  0xfa   : > { %v641_v24 = vadd.f32 %v2587_v18, %v640_v20 }
  0xfb   : > { %v3378_v29 = vmax.f32 %v646_v21, 0.0  ;;  %v733_v32 = vpop.f32.mrb[0].mxu1 }
  0xfc   : > { %v2792_v26 = vpop.f32.mrb[2].mxu0  ;;  %v3387_v36 = vmax.f32 %v641_v24, 0.0  ;;  %v734_v37 = vadd.f32 %v2587_v18, %v733_v32  ;;  %v2803_v38 = vpop.f32.mrb[1].mxu1 }
  0xfd   : > { %v656_v27 = vadd.f32 %v2792_v26, %v2587_v18  ;;  %v650_v28 = vpop.f32.mrb[3].mxu0  ;;  %v886_v45 = vrot.slane %v3378_v29, 7  ;;  %v907_v0 = vrot.slane %v3378_v29, 1  ;;  %v2608_v26 = vld [vmem:[%s3850_s5 + $0x18] sm:$0xff] }
  0xfe   : > { %v651_v30 = vadd.f32 %v2587_v18, %v650_v28  ;;  %v737_v42 = vmax.f32 %v734_v37, 0.0  ;;  %v3412_v50 = vrot.slane %v3387_v36, 7  ;;  %v906_v16 = vrot.slane %v3387_v36, 1 }
  0xff   : > { %v3391_v40 = vmax.f32 %v656_v27, 0.0 }
 0x100   : > { %v3389_v39 = vmax.f32 %v651_v30, 0.0  ;;  %v3416_v51 = vsel %vm3380_vm2, 0.0, %v737_v42  ;;  %v808_v52 = vpop.f32.mrb[4].mxu0  ;;  %v911_v38 = vsel %vm909_vm5, %v906_v16, %v907_v0  ;;  %v2613_v42 = vld [vmem:[%s3850_s5 + $0x20] sm:$0xff] }
 0x101   : > { %v884_v55 = vrot.slane %v3416_v51, 7  ;;  %2817 = vmatprep.mubr.msk.f32.mxu1 %vm957_vm3, %v3416_v51  ;;  %v809_v56 = vadd.f32 %v2587_v18, %v808_v52  ;;  %v926_v58 = vrot.slane %v3391_v40, 7  ;;  %v3433_v59 = vrot.slane %v3391_v40, 1  ;;  %v2814_v60 = vpop.f32.mrb[5].mxu0 }
 0x102   : > { %v887_v43 = vrot.slane %v3389_v39, 7  ;;  %v3423_v54 = vrot.slane %v3389_v39, 1  ;;  %2818 = vmatmul.mubr.msk.f32.vlgmr.msra.gmra.mrb[2].mxu1 %vm957_vm3, %v3387_v36  ;;  %v905_v18 = vrot.slane %v3416_v51, 1  ;;  %v923_v41 = vsel %vm3453_vm11, 0.0, %v911_v38 }
 0x103   : > { %v812_v1 = vmax.f32 %v809_v56, 0.0  ;;  %2824 = vmatpush3.msra.mxu1 %v954_v15  ;;  %2820 = vmatprep.mubr.msk.f32.mxu1 %vm957_vm3, %v3378_v29  ;;  %v891_v10 = vsel %vm888_vm4, %v884_v55, %v3412_v50  ;;  %v890_v15 = vsel %vm888_vm4, %v3412_v50, %v886_v45  ;;  %v928_v46 = vsel %vm888_vm4, %v926_v58, %v3412_v50  ;;  %v2618_v50 = vld [vmem:[%s3850_s5 + $0x28] sm:$0xff] }
 0x104   : > { %v3420_v53 = vsel %vm888_vm4, %v886_v45, %v887_v43  ;;  %v892_v2 = vsel %vm888_vm4, %v887_v43, %v884_v55  ;;  %2831 = vmatprep.subr.mxu1 %v2603_v57  ;;  %v3474_v8 = vsel %vm909_vm5, %v907_v0, %v3423_v54  ;;  %v3485_v11 = vsel %vm888_vm4, %v887_v43, %v926_v58 }
 0x105   : > { %v944_v62 = vsel %vm3397_vm6, 0.0, %v3420_v53  ;;  %v901_v5 = vsel %vm3403_vm7, 0.0, %v892_v2  ;;  %v3478_v9 = vsel %vm3435_vm9, 0.0, %v812_v1  ;;  %v3491_v12 = vsel %vm909_vm5, %v3423_v54, %v3433_v59  ;;  %v1571_v1 = vld [vmem:[%s3852_s7 + $0x8] sm:$0xff] }
 0x106   : > { %v940_v13 = vrot.slane %v3478_v9, 7  ;;  %v947_v14 = vrot.slane %v3478_v9, 1  ;;  %2821 = vmatmul.mubr.msk.f32.gmra.mrb[4].mxu1 %vm957_vm3, %v3389_v39  ;;  %v951_v19 = vsel %vm3453_vm11, 0.0, %v3491_v12  ;;  %v945_v20 = vsel %vm3407_vm8, 0.0, %v3485_v11 }
 0x107   : > { %2825 = vmatprep.mubr.msk.f32.mxu1 %vm957_vm3, %v901_v5  ;;  %v950_v21 = vsel %vm3444_vm10, 0.0, %v3474_v8  ;;  %v902_v22 = vsel %vm3397_vm6, 0.0, %v891_v10  ;;  %v903_v32 = vsel %vm3407_vm8, 0.0, %v890_v15  ;;  %v912_v34 = vsel %vm909_vm5, %v905_v18, %v906_v16 }
 0x108   : > { %v3516_v23 = vsel %vm888_vm4, %v940_v13, %v886_v45  ;;  %v3520_v24 = vsel %vm888_vm4, %v926_v58, %v940_v13  ;;  %v3525_v25 = vsel %vm909_vm5, %v3433_v59, %v947_v14  ;;  %v3541_v31 = vsel %vm909_vm5, %v947_v14, %v907_v0  ;;  %v1570_v0 = vld [vmem:[%s3852_s7] sm:$0xff] }
 0x109   : > { %v943_v27 = vsel %vm3403_vm7, 0.0, %v3516_v23  ;;  %v946_v28 = vsel %vm3463_vm13, 0.0, %v3520_v24  ;;  %v952_v30 = vsel %vm3467_vm14, 0.0, %v3525_v25  ;;  %v953_v33 = vsel %vm3457_vm12, 0.0, %v3541_v31 }
 0x10a   : > { %2826 = vmatmul.mubr.msk.f32.vlgmr.msra.gmra.mrb[2].mxu1 %vm957_vm3, %v902_v22  ;;  %v904_v35 = vsel %vm3463_vm13, 0.0, %v3420_v53  ;;  %v922_v37 = vsel %vm3444_vm10, 0.0, %v912_v34  ;;  %v924_v43 = vsel %vm3467_vm14, 0.0, %v3474_v8  ;;  %v913_v45 = vsel %vm909_vm5, %v3423_v54, %v905_v18  ;;  %v2629_v34 = vld [vmem:[%s3850_s5 + $0x30] sm:$0xff] }
 0x10b   : > { %2832 = vmatpush3.msra.mxu1 %v2603_v57  ;;  %2828 = vmatprep.mubr.msk.f32.mxu1 %vm957_vm3, %v903_v32  ;;  %v925_v49 = vsel %vm3457_vm12, 0.0, %v913_v45  ;;  %v3582_v51 = vsel %vm3403_vm7, 0.0, %v928_v46  ;;  %v3588_v52 = vsel %vm3397_vm6, 0.0, %v890_v15  ;;  %v3598_v54 = vsel %vm3407_vm8, 0.0, %v3420_v53 }
 0x10c   : > { %2839 = vmatprep.subr.mxu1 %v2608_v26  ;;  %v932_v55 = vsel %vm3463_vm13, 0.0, %v3485_v11  ;;  %v936_v56 = vsel %vm3444_vm10, 0.0, %v911_v38  ;;  %v937_v57 = vsel %vm3453_vm11, 0.0, %v3474_v8  ;;  %v938_v58 = vsel %vm3467_vm14, 0.0, %v3491_v12  ;;  %v2639_v38 = vld [vmem:[%s3850_s5 + $0x40] sm:$0xff] }
 0x10d   : > { %v935_v60 = vsel %vm909_vm5, %v3433_v59, %v906_v16  ;;  %v2951_v2 = vpack.c.bf16 %v1571_v1, %v1570_v0  ;;  %v3643_v59 = vld [vmem:[%s3851_s6] ss:$0 sm:$0xff] }
 0x10e   : > { %2829 = vmatmul.mubr.msk.f32.gmra.mrb[4].mxu1 %vm957_vm3, %v904_v35  ;;  %v939_v61 = vsel %vm3457_vm12, 0.0, %v935_v60 }
 0x10f   : > { %2833 = vmatprep.mubr.msk.f32.mxu1 %vm957_vm3, %v922_v37  ;;  %2952 = vmatprep.subr.bf16.mxu0 %v2951_v2 }
 0x110   : > { %2954 = vmatpush3.bf16.msra.mxu0 %v2951_v2 }
 0x111   : > { %2873 = vmatprep.subr.mxu0 %v2630_v17 }
 0x112   : > { %2834 = vmatmul.mubr.msk.f32.vlgmr.msra.gmra.mrb[2].mxu1 %vm957_vm3, %v923_v41  ;;  %v2649_v41 = vld [vmem:[%s3850_s5 + $0x50] sm:$0xff] }
 0x113   : > { %2840 = vmatpush3.msra.mxu1 %v2608_v26  ;;  %2836 = vmatprep.mubr.msk.f32.mxu1 %vm957_vm3, %v924_v43 }
 0x114   : > { %2847 = vmatprep.subr.mxu1 %v2613_v42 }
 0x116   : > { %2837 = vmatmul.mubr.msk.f32.gmra.mrb[4].mxu1 %vm957_vm3, %v925_v49 }
 0x117   : > { %2841 = vmatprep.mubr.msk.f32.mxu1 %vm957_vm3, %v3582_v51 }
 0x11a   : > { %2842 = vmatmul.mubr.msk.f32.vlgmr.msra.gmra.mrb[2].mxu1 %vm957_vm3, %v3588_v52 }
 0x11b   : > { %2848 = vmatpush3.msra.mxu1 %v2613_v42  ;;  %2844 = vmatprep.mubr.msk.f32.mxu1 %vm957_vm3, %v3598_v54  ;;  %v2654_v42 = vld [vmem:[%s3850_s5 + $0x58] sm:$0xff] }
 0x11c   : > { %2855 = vmatprep.subr.mxu1 %v2618_v50 }
 0x11e   : > { %2845 = vmatmul.mubr.msk.f32.gmra.mrb[4].mxu1 %vm957_vm3, %v932_v55 }
 0x11f   : > { %2849 = vmatprep.mubr.msk.f32.mxu1 %vm957_vm3, %v3387_v36 }
 0x122   : > { %2850 = vmatmul.mubr.msk.f32.vlgmr.msra.gmra.mrb[2].mxu1 %vm957_vm3, %v3378_v29 }
 0x123   : > { %2856 = vmatpush3.msra.mxu1 %v2618_v50  ;;  %2852 = vmatprep.mubr.msk.f32.mxu1 %vm957_vm3, %v3389_v39 }
 0x124   : > { %2959 = vmatprep.subr.bf16.mxu1 %v2951_v2 }
 0x126   : > { %2853 = vmatmul.mubr.msk.f32.gmra.mrb[4].mxu1 %vm957_vm3, %v3391_v40 }
 0x127   : > { %2857 = vmatprep.mubr.msk.f32.mxu1 %vm957_vm3, %v936_v56 }
 0x12a   : > { %2858 = vmatmul.mubr.msk.f32.vlgmr.msra.gmra.mrb[2].mxu1 %vm957_vm3, %v937_v57 }
 0x12b   : > { %2860 = vmatprep.mubr.msk.f32.mxu1 %vm957_vm3, %v938_v58  ;;  %2960 = vmatpush3.bf16.msra.mxu1 %v2951_v2 }
 0x12c   : > { %2956 = vmatprep.subr.bf16.mxu1 %v2951_v2 }
 0x12e   : > { %2861 = vmatmul.mubr.msk.f32.gmra.mrb[4].mxu1 %vm957_vm3, %v939_v61 }
 0x1fd   : > { %v2859_v5 = vpop.f32.mrb[2].mxu1 }
 0x1fe   : > { %v1563_v10 = vadd.f32 %v2859_v5, %v3643_v59  ;;  %v1532_v13 = vpop.f32.mrb[3].mxu1 }
 0x1ff   : > { %v1562_v14 = vadd.f32 %v3643_v59, %v1532_v13  ;;  %v2667_v13 = vld [vmem:[%s3743_s24 + $0x28] sm:$0xff] }
 0x200   : > { %v1567_v18 = vmax.f32 %v1563_v10, 0.0 }
 0x201   : > { %v1566_v15 = vmax.f32 %v1562_v14, 0.0  ;;  %v2862_v16 = vpop.f32.mrb[4].mxu1 }
 0x202   : > { %v1565_v22 = vadd.f32 %v2862_v16, %v3643_v59  ;;  %v1542_v26 = vpop.f32.mrb[5].mxu1 }
 0x203   : > { %v1564_v32 = vadd.f32 %v3643_v59, %v1542_v26  ;;  %2867 = vmatprep.mubr.msk.f32.mxu0 %vm1579_vm15, %v1566_v15 }
 0x204   : > { %2868 = vmatmul.mubr.msk.f32.vlgmr.msra.gmra.mrb[6].mxu0 %vm1579_vm15, %v1567_v18  ;;  %v1569_v37 = vmax.f32 %v1565_v22, 0.0 }
 0x205   : > { %v1568_v35 = vmax.f32 %v1564_v32, 0.0  ;;  %2874 = vmatpush3.msra.mxu0 %v2630_v17  ;;  %2875 = vmatprep.mubr.msk.f32.mxu0 %vm957_vm3, %v3387_v36  ;;  %v2644_v36 = vld [vmem:[%s3850_s5 + $0x48] sm:$0xff] }
 0x206   : > { %2881 = vmatprep.subr.mxu0 %v2629_v34 }
 0x207   : > { %2870 = vmatprep.mubr.msk.f32.mxu1 %vm1579_vm15, %v1568_v35 }
 0x208   : > { %2871 = vmatmul.mubr.msk.f32.vlgmr.msra.gmra.mrb[6].mxu1 %vm1579_vm15, %v1569_v37  ;;  %2876 = vmatmul.mubr.msk.f32.vlgmr.msra.gmra.mrb[8].mxu0 %vm957_vm3, %v3378_v29 }
 0x209   : > { %2882 = vmatpush3.msra.mxu0 %v2629_v34  ;;  %2878 = vmatprep.mubr.msk.f32.mxu0 %vm957_vm3, %v3389_v39 }
 0x20a   : > { %2889 = vmatprep.subr.mxu0 %v2639_v38  ;;  %2958 = vmatpush3.bf16.msra.mxu1 %v2951_v2 }
 0x20c   : > { %2879 = vmatmul.mubr.msk.f32.gmra.mrb[10].mxu0 %vm957_vm3, %v3391_v40 }
 0x20d   : > { %2883 = vmatprep.mubr.msk.f32.mxu0 %vm957_vm3, %v3582_v51 }
 0x210   : > { %2884 = vmatmul.mubr.msk.f32.vlgmr.msra.gmra.mrb[8].mxu0 %vm957_vm3, %v3588_v52 }
 0x211   : > { %2890 = vmatpush3.msra.mxu0 %v2639_v38  ;;  %2886 = vmatprep.mubr.msk.f32.mxu0 %vm957_vm3, %v3598_v54 }
 0x212   : > { %2897 = vmatprep.subr.mxu0 %v2644_v36 }
 0x214   : > { %2887 = vmatmul.mubr.msk.f32.gmra.mrb[10].mxu0 %vm957_vm3, %v932_v55  ;;  %v2666_v55 = vld [vmem:[%s3743_s24 + $0x18] sm:$0xff] }
 0x215   : > { %2891 = vmatprep.mubr.msk.f32.mxu0 %vm957_vm3, %v936_v56 }
 0x218   : > { %2892 = vmatmul.mubr.msk.f32.vlgmr.msra.gmra.mrb[8].mxu0 %vm957_vm3, %v937_v57 }
 0x219   : > { %2898 = vmatpush3.msra.mxu0 %v2644_v36  ;;  %2894 = vmatprep.mubr.msk.f32.mxu0 %vm957_vm3, %v938_v58  ;;  %v2665_v58 = vld [vmem:[%s3743_s24 + $0x8] sm:$0xff] }
 0x21a   : > { %2905 = vmatprep.subr.mxu0 %v2649_v41 }
 0x21c   : > { %2895 = vmatmul.mubr.msk.f32.gmra.mrb[10].mxu0 %vm957_vm3, %v939_v61 }
 0x21d   : > { %2899 = vmatprep.mubr.msk.f32.mxu0 %vm957_vm3, %v943_v27 }
 0x220   : > { %2900 = vmatmul.mubr.msk.f32.vlgmr.msra.gmra.mrb[8].mxu0 %vm957_vm3, %v944_v62  ;;  %v1681_v62 = vld [vmem:[%s3743_s24] sm:$0xff] }
 0x221   : > { %2906 = vmatpush3.msra.mxu0 %v2649_v41  ;;  %2902 = vmatprep.mubr.msk.f32.mxu0 %vm957_vm3, %v945_v20 }
 0x222   : > { %2913 = vmatprep.subr.mxu0 %v2654_v42 }
 0x224   : > { %2903 = vmatmul.mubr.msk.f32.gmra.mrb[10].mxu0 %vm957_vm3, %v946_v28 }
 0x225   : > { %2907 = vmatprep.mubr.msk.f32.mxu0 %vm957_vm3, %v3378_v29  ;;  %v2624_v29 = vld [vmem:[%s3853_s8] ss:$0 sm:$0xff] }
 0x228   : > { %2908 = vmatmul.mubr.msk.f32.vlgmr.msra.gmra.mrb[8].mxu0 %vm957_vm3, %v3389_v39 }
 0x229   : > { %2914 = vmatpush3.msra.mxu0 %v2654_v42  ;;  %2910 = vmatprep.mubr.msk.f32.mxu0 %vm957_vm3, %v3391_v40 }
 0x22c   : > { %2911 = vmatmul.mubr.msk.f32.gmra.mrb[10].mxu0 %vm957_vm3, %v3478_v9  ;;  %v1684_v9 = vld [vmem:[%s3743_s24 + $0x30] sm:$0xff] }
 0x22d   : > { %2915 = vmatprep.mubr.msk.f32.mxu0 %vm957_vm3, %v950_v21 }
 0x230   : > { %2916 = vmatmul.mubr.msk.f32.vlgmr.msra.gmra.mrb[8].mxu0 %vm957_vm3, %v951_v19  ;;  %v1683_v19 = vld [vmem:[%s3743_s24 + $0x20] sm:$0xff] }
 0x231   : > { %2918 = vmatprep.mubr.msk.f32.mxu0 %vm957_vm3, %v952_v30 }
 0x234   : > { %2919 = vmatmul.mubr.msk.f32.gmra.mrb[10].mxu0 %vm957_vm3, %v953_v33 }
 0x2d7   : > { %v2869_v39 = vpop.f32.mrb[6].mxu0 }
 0x2d8   : > { %v1664_v40 = vadd.f32 %v2869_v39, %v2624_v29  ;;  %v1658_v44 = vpop.f32.mrb[7].mxu0 }
 0x2d9   : > { %v1659_v48 = vadd.f32 %v2624_v29, %v1658_v44 }
 0x2da   : > { %v1678_v53 = vmax.f32 %v1664_v40, 0.0 }
 0x2db   : > { %v1677_v63 = vmax.f32 %v1659_v48, 0.0  ;;  %v2872_v3 = vpop.f32.mrb[6].mxu1 }
 0x2dc   : > { %v1686_v4 = vadd.f32 %v1682_v47, %v1678_v53  ;;  %v1674_v6 = vadd.f32 %v2872_v3, %v2624_v29  ;;  %v1668_v7 = vpop.f32.mrb[7].mxu1 }
 0x2dd   : > { %v1685_v8 = vadd.f32 %v1681_v62, %v1677_v63  ;;  %v1669_v11 = vadd.f32 %v2624_v29, %v1668_v7 }
 0x2de   : > { %1690 = vst.msk [vmem:[%s3750_s29 + $0x10] sm:$0xff] %vm561_vm1, %v1686_v4  ;;  %v1680_v12 = vmax.f32 %v1674_v6, 0.0 }
 0x2df   : > { %1689 = vst.msk [vmem:[%s3750_s29] sm:$0xff] %vm561_vm1, %v1685_v8  ;;  %v1679_v20 = vmax.f32 %v1669_v11, 0.0 }
 0x2e0   : > { %v1688_v21 = vadd.f32 %v1684_v9, %v1680_v12 }
 0x2e1   : > { %v1687_v23 = vadd.f32 %v1683_v19, %v1679_v20 }
 0x2e2   : > { %1692 = vst.msk [vmem:[%s3750_s29 + $0x30] sm:$0xff] %vm561_vm1, %v1688_v21 }
 0x2e3   : > { %1691 = vst.msk [vmem:[%s3750_s29 + $0x20] sm:$0xff] %vm561_vm1, %v1687_v23 }
 0x303   : > { %v2917_v24 = vpop.f32.mrb[8].mxu0 }
 0x304   : > { %v2266_v25 = vadd.f32 %v2917_v24, %v3643_v59  ;;  %v2235_v27 = vpop.f32.mrb[9].mxu0 }
 0x305   : > { %v2265_v28 = vadd.f32 %v3643_v59, %v2235_v27 }
 0x306   : > { %v2270_v33 = vmax.f32 %v2266_v25, 0.0 }
 0x307   : > { %v2269_v30 = vmax.f32 %v2265_v28, 0.0  ;;  %v2920_v31 = vpop.f32.mrb[10].mxu0 }
 0x308   : > { %v2268_v43 = vadd.f32 %v2920_v31, %v3643_v59  ;;  %v2245_v45 = vpop.f32.mrb[11].mxu0 }
 0x309   : > { %v2267_v46 = vadd.f32 %v3643_v59, %v2245_v45  ;;  %2925 = vmatprep.mubr.msk.f32.mxu1 %vm1579_vm15, %v2269_v30  ;;  %v2668_v59 = vld [vmem:[%s3743_s24 + $0x38] sm:$0xff]  ;;  %s3081_s24 = sshll.u32 %s3176_s12, 4  ;;  %s3082_s24 = int_to_ptr.vmem [resolvable:$false] %s3081_s24 }
 0x30a   : > { %2926 = vmatmul.mubr.msk.f32.vlgmr.msra.gmra.mrb[8].mxu1 %vm1579_vm15, %v2270_v33  ;;  %v2272_v51 = vmax.f32 %v2268_v43, 0.0  ;;  %s3083_s30 = scalar_lea.vmem %s3082_s24, 2048  ;;  %p3084_p10 = scmp.lt.s32.totalorder %s3785_s17, %s3082_s24 }
 0x30b   : > { %v2271_v49 = vmax.f32 %v2267_v46, 0.0  ;;  %p3085_p11 = scmp.lt.s32.totalorder %s3083_s30, %s3077_s18 }
 0x30d   : > { %2928 = vmatprep.mubr.msk.f32.mxu1 %vm1579_vm15, %v2271_v49  ;;  %p3086_p12 = por %p3085_p11, %p3084_p10 }
 0x30e   : > { %2929 = vmatmul.mubr.msk.f32.gmra.mrb[10].mxu1 %vm1579_vm15, %v2272_v51 }
 0x30f   : > { %p3087_p13 = pnand %p3086_p12, %p3080_p9 }
 0x3dd   : > { %v2927_v52 = vpop.f32.mrb[8].mxu1 }
 0x3de   : > { %v2366_v50 = vadd.f32 %v2927_v52, %v2624_v29  ;;  %v2360_v54 = vpop.f32.mrb[9].mxu1 }
 0x3df   : > { %v2361_v56 = vadd.f32 %v2624_v29, %v2360_v54 }
 0x3e0   : > { %v2380_v57 = vmax.f32 %v2366_v50, 0.0 }
 0x3e1   : > { %v2379_v60 = vmax.f32 %v2361_v56, 0.0  ;;  %v2930_v61 = vpop.f32.mrb[10].mxu1 }
 0x3e2   : > { %v2389_v0 = vadd.f32 %v2666_v55, %v2380_v57  ;;  %v2376_v1 = vadd.f32 %v2930_v61, %v2624_v29  ;;  %v2370_v2 = vpop.f32.mrb[11].mxu1 }
 0x3e3   : > { %v2388_v17 = vadd.f32 %v2665_v58, %v2379_v60  ;;  %v2371_v5 = vadd.f32 %v2624_v29, %v2370_v2 }
 0x3e4   : > { %2670 = vst.msk [vmem:[%s3750_s29 + $0x18] sm:$0xff] %vm561_vm1, %v2389_v0  ;;  %v2382_v10 = vmax.f32 %v2376_v1, 0.0 }
 0x3e5   : > { %2669 = vst.msk [vmem:[%s3750_s29 + $0x8] sm:$0xff] %vm561_vm1, %v2388_v17  ;;  %v2381_v14 = vmax.f32 %v2371_v5, 0.0 }
 0x3e6   : > { %v2391_v15 = vadd.f32 %v2668_v59, %v2382_v10 }
 0x3e7   : > { %v2390_v16 = vadd.f32 %v2667_v13, %v2381_v14 }
 0x3e8   : > { %2672 = vst.msk [vmem:[%s3750_s29 + $0x38] sm:$0xff] %vm561_vm1, %v2391_v15 }
 0x3e9   : > { %2671 = vst.msk [vmem:[%s3750_s29 + $0x28] sm:$0xff] %vm561_vm1, %v2390_v16 }
 0x3ea   : > { %3090 = shalt.err (!%p3087_p13)
}
 0x3eb   : > { %s3091_s3 = scalar_lea.hbm %s3783_s19, 1024  ;;  %s3095_s11 = scalar_lea.hbm %s3855_s10, 4096 }
 0x3ec   : > { %p3092_p0 = scmp.ne.s32.totalorder %s3783_s19, %s3091_s3  ;;  %p3096_p4 = scmp.lt.u32.totalorder %s3783_s19, %s3855_s10 }
 0x3ed   : > { %p3097_p5 = scmp.lt.u32.totalorder %s3095_s11, %s3091_s3  ;;  %p3099_p7 = scmp.lt.u32.totalorder %s3091_s3, %s3783_s19 }
 0x3ee   : > { %p3093_p1 = pnand %p3092_p0, %p3285_p3 }
 0x3ef   : > { %p3098_p6 = por %p3097_p5, %p3096_p4 }
 0x3f0   : > { %p3094_p2 = pneg %p3093_p1 }
 0x3f1   : > { %p3100_p9 = por %p3099_p7, %p3098_p6 }
 0x3f3   : > { %p3101_p10 = pnand %p3100_p9, %p3094_p2 }
 0x3f5   : > { %3104 = shalt.err (!%p3101_p10)
}
 0x3f6   : > { %s3177_s28 = smov 128   ;;  %s3178_s23 = smov 8  }
 0x3f7   : > { %3001 = dma.vmem_to_hbm [thread:$0]  (%p3285_p3), %s3785_s17, 1024, %s3783_s19, %s3793_s25, %s3177_s28, %s3177_s28, %s3178_s23  }
 0x3f8 PF: > { %p3007_p11 = scmp.ge.s32.totalorder %s3171_s20, 2  ;;  %s2429_s18 = sand.u32 1, %s3143_s13  }
 0x3f9   : > { %s2430_s12 = scalar_lea.sflag [#allocation3], %s2429_s18 }
 0x3fa   : > { %p3004_p12 = pnand %p3007_p11, %p3294_p8 }
 0x3fc   : > { %3138 = dma.done.wait (!%p3004_p12), %s2430_s12, 1024  }
 0x3fd   : > { %3140 = vsyncadd (!%p3004_p12), %s2430_s12, 4294966272  ;;  %s23_s20 = sadd.s32 1, %s3171_s20   ;;  %s3890_s24 = sld [smem:[#allocation9_spill]] }
 0x3fe   : > { %p20_p13 = scmp.ge.s32.totalorder %s23_s20, 6   ;;  %s3891_s16 = sld [smem:[#allocation5_spill]] }
 0x3ff   : > { %s3892_s17 = sld [smem:[#allocation6_spill]]  ;;  %s3893_s18 = sld [smem:[#allocation7_spill]] }
 0x400   : > { %s3894_s19 = sld [smem:[#allocation8_spill]]  ;;  %s3895_s13 = smov %s3147_s14 }
 0x401   : > { %s3896_s14 = smov %s3151_s15  ;;  %22 = sbr.rel (!%p20_p13) target bundleno = 7 (0x7), region = 117 }
 0x403   : > { %s3897_s15 = smov %s3890_s24 }
 0x408   :  { %2435 = vsyncpa [#allocation3], 1 }
 0x409   :  { %2437 = vsyncpa [#allocation3 + $0x1], 1 }

</bundles_post_ra>
